<compile_context>
chip_gen: v7x
topology: tpu7x:2x2x1
jax: 0.10.0
libtpu: 0.0.40
codegen_flags: <defaults>
</compile_context>

<pallas_src>
import functools

import jax
import jax.numpy as jnp
from jax.experimental import pallas as pl
from jax.experimental.pallas import tpu as pltpu


def _round_up(v, m):
    return (v + m - 1) // m * m


def gru_cell_kernel(x_ref, h_ref, wx_ref, wh_ref, bsum_ref, bhm_ref, out_ref,
                    *, tn):
    """One (hidden-tile, batch-tile) block of the GRU cell.

    x_ref    : (tb, Ip)       input slab
    h_ref    : (tb, Hp)       full previous hidden state (contraction dim)
    wx_ref   : (Ip, 3*tn)     fused x-path weights [reset|update|memory]
    wh_ref   : (Hp, 3*tn)     fused h-path weights [reset|update|memory]
    bsum_ref : (1, 3*tn)      f32 bias [bx_r+bh_r | bx_u+bh_u | bx_m]
    bhm_ref  : (1, tn)        f32 memory-gate h-bias (kept separate: z_reset*mh)
    out_ref  : (tb, tn)       h_t tile
    """
    cdt = wx_ref.dtype                      # bf16 (perf) or f32 (parity)
    x = x_ref[...].astype(cdt)
    hm = h_ref[...].astype(cdt)

    # Two fused MXU matmuls (lane dim = 3*tn, multiple of 128), f32 accumulate.
    gx = jnp.dot(x, wx_ref[...], preferred_element_type=jnp.float32) + bsum_ref[...]
    gh = jnp.dot(hm, wh_ref[...], preferred_element_type=jnp.float32)

    # Static, lane-aligned gate slices.
    rx, ux, mx = gx[:, :tn], gx[:, tn:2 * tn], gx[:, 2 * tn:]
    rh, uh = gh[:, :tn], gh[:, tn:2 * tn]
    mh = gh[:, 2 * tn:] + bhm_ref[...]

    z_reset = jax.nn.sigmoid(rx + rh)
    z_update = jax.nn.sigmoid(ux + uh)
    current_memory = jnp.tanh(mx + z_reset * mh)

    # Epilogue hidden tile: slice from the already-resident full h block
    # (f32 exact), no extra input / DMA per grid step.
    start = pl.multiple_of(pl.program_id(0) * tn, 128)
    h_tile = h_ref[:, pl.ds(start, tn)].astype(jnp.float32)

    # z*h + (1-z)*cm  ==  cm + z*(h - cm)   (one fewer VALU op per element)
    out_ref[...] = (current_memory +
                    z_update * (h_tile - current_memory)).astype(out_ref.dtype)


def prepare_gru_params(w_ih, w_hh, b_ih, b_hh, *, max_tile_n=256,
                       weight_dtype=jnp.bfloat16):
    """One-time parameter re-layout.  Call OFF the per-step hot path.

    w_ih : (3H, I)   w_hh : (3H, H)   b_* : (3H,)
    Returns:
      wx   : (NH, Ip, 3*tn)  weight_dtype
      wh   : (NH, Hp, 3*tn)  weight_dtype
      bsum : (NH, 1, 3*tn)   f32   [bx_r+bh_r | bx_u+bh_u | bx_m]
      bhm  : (NH, 1, tn)     f32   memory-gate h-bias
    """
    three_h, input_size = w_ih.shape
    H = three_h // 3
    Ip = _round_up(input_size, 128)
    Hp = _round_up(H, 128)

    # Tile-N: multiple of 128, divides Hp, <= max_tile_n, and >= 2 tiles
    # whenever Hp >= 256 so v7x's second TensorCore has work.
    if Hp <= 128:
        tn = Hp
    else:
        tn = 128
        for cand in (512, 256):
            if cand <= max_tile_n and Hp % cand == 0 and Hp // cand >= 2:
                tn = cand
                break
    NH = Hp // tn

    def _pack_w(w, in_dim, in_pad):
        # (3H, in_dim) -> W = w.T : (in_dim, 3H), then [gate, hidden-tile] pack.
        wt = jnp.transpose(w).reshape(in_dim, 3, H)
        wt = jnp.pad(wt, ((0, in_pad - in_dim), (0, 0), (0, Hp - H)))
        wt = wt.reshape(in_pad, 3, NH, tn).transpose(2, 0, 1, 3)
        return wt.reshape(NH, in_pad, 3 * tn).astype(weight_dtype)

    bx3 = jnp.pad(b_ih.astype(jnp.float32).reshape(3, H), ((0, 0), (0, Hp - H)))
    bh3 = jnp.pad(b_hh.astype(jnp.float32).reshape(3, H), ((0, 0), (0, Hp - H)))
    # Pre-sum reset/update biases; memory-gate h-bias must stay separate.
    bsum3 = jnp.concatenate([bx3[:2] + bh3[:2], bx3[2:3]], axis=0)
    bsum = bsum3.reshape(3, NH, tn).transpose(1, 0, 2).reshape(NH, 1, 3 * tn)
    bhm = bh3[2].reshape(NH, 1, tn)

    wx = _pack_w(w_ih, input_size, Ip)
    wh = _pack_w(w_hh, H, Hp)
    return wx, wh, bsum, bhm


@functools.partial(jax.jit, static_argnames=("hidden_size",))
def gru_cell_forward(x, h, wx, wh, bsum, bhm, *, hidden_size):
    """Pallas GRU cell.  x:(B,I)  h:(B,H)  params from prepare_gru_params."""
    B, I = x.shape
    H = h.shape[1]
    NH, Ip, three_tn = wx.shape
    tn = three_tn // 3
    Hp = wh.shape[1]

    # Batch padding / tiling: sublane-aligned, MXU-friendly M dim.
    if B <= 128:
        Bp = _round_up(B, 8)
        # If the hidden axis has a single tile, split the batch in two when
        # possible so v7x's second TensorCore is not idle.
        if NH == 1 and Bp >= 16 and Bp % 16 == 0:
            tb = Bp // 2
        else:
            tb = Bp
    else:
        Bp = _round_up(B, 128)
        tb = 128

    # Skip the wrapper-side pad entirely when already (8,128)-aligned.
    x_p = x if (Bp == B and Ip == I) else jnp.pad(x, ((0, Bp - B), (0, Ip - I)))
    h_p = h if (Bp == B and Hp == H) else jnp.pad(h, ((0, Bp - B), (0, Hp - H)))

    kernel = functools.partial(gru_cell_kernel, tn=tn)

    out_p = pl.pallas_call(
        kernel,
        out_shape=jax.ShapeDtypeStruct((Bp, Hp), x.dtype),
        # Hidden tiles outermost: the weight block index is constant across
        # the inner batch loop, so weights are not re-DMA'd per batch tile.
        grid=(NH, Bp // tb),
        in_specs=[
            pl.BlockSpec((tb, Ip), lambda n, b: (b, 0)),                 # x
            pl.BlockSpec((tb, Hp), lambda n, b: (b, 0)),                 # h (full)
            pl.BlockSpec((None, Ip, three_tn), lambda n, b: (n, 0, 0)),  # wx
            pl.BlockSpec((None, Hp, three_tn), lambda n, b: (n, 0, 0)),  # wh
            pl.BlockSpec((None, 1, three_tn), lambda n, b: (n, 0, 0)),   # bsum
            pl.BlockSpec((None, 1, tn), lambda n, b: (n, 0, 0)),         # bh_mem
        ],
        out_specs=pl.BlockSpec((tb, tn), lambda n, b: (b, n)),
        compiler_params=pltpu.CompilerParams(
            dimension_semantics=("parallel", "parallel"),
            # 40 MiB scoped VMEM: above v5e's 16 MiB / v6e's 32 MiB defaults,
            # safely inside v7x's 64 MiB physical VMEM with bf16 weights.
            vmem_limit_bytes=40 * 1024 * 1024,
        ),
    )(x_p, h_p, wx, wh, bsum, bhm)

    return out_p[:B, :hidden_size]


def reference_gru(x, h, w_ih, w_hh, b_ih, b_hh):
    """Pure-JAX reference matching the PyTorch forward exactly."""
    H = h.shape[1]
    gx = x @ w_ih.T + b_ih
    gh = h @ w_hh.T + b_hh
    rx, ux, mx = gx[:, :H], gx[:, H:2 * H], gx[:, 2 * H:]
    rh, uh, mh = gh[:, :H], gh[:, H:2 * H], gh[:, 2 * H:]
    z_reset = jax.nn.sigmoid(rx + rh)
    z_update = jax.nn.sigmoid(ux + uh)
    current_memory = jnp.tanh(mx + z_reset * mh)
    return z_update * h + (1.0 - z_update) * current_memory


if __name__ == "__main__":
    # Small shapes consistent with the module: batch=2, input=16, hidden=32.
    B, INPUT_SIZE, HIDDEN_SIZE = 2, 16, 32
    K = 1.0 / jnp.sqrt(jnp.float32(HIDDEN_SIZE))

    key = jax.random.PRNGKey(0)
    k_wih, k_whh, k_bih, k_bhh, k_x, k_h = jax.random.split(key, 6)

    # Deterministic init mirroring torch.rand(...)*2K - K  (uniform in [-K, K))
    w_ih = jax.random.uniform(k_wih, (3 * HIDDEN_SIZE, INPUT_SIZE),
                              dtype=jnp.float32) * 2 * K - K
    w_hh = jax.random.uniform(k_whh, (3 * HIDDEN_SIZE, HIDDEN_SIZE),
                              dtype=jnp.float32) * 2 * K - K
    b_ih = jax.random.uniform(k_bih, (3 * HIDDEN_SIZE,),
                              dtype=jnp.float32) * 2 * K - K
    b_hh = jax.random.uniform(k_bhh, (3 * HIDDEN_SIZE,),
                              dtype=jnp.float32) * 2 * K - K

    x = jax.random.normal(k_x, (B, INPUT_SIZE), dtype=jnp.float32)
    h = jax.random.normal(k_h, (B, HIDDEN_SIZE), dtype=jnp.float32)

    h_ref = reference_gru(x, h, w_ih, w_hh, b_ih, b_hh)

    # f32 parity path: exact match against the PyTorch-style reference.
    p32 = prepare_gru_params(w_ih, w_hh, b_ih, b_hh, weight_dtype=jnp.float32)
    h32 = gru_cell_forward(x, h, *p32, hidden_size=HIDDEN_SIZE)

    # bf16 weight path: production / perf path (weight-bandwidth-bound regime).
    p16 = prepare_gru_params(w_ih, w_hh, b_ih, b_hh)   # default bf16 weights
    h16 = gru_cell_forward(x, h, *p16, hidden_size=HIDDEN_SIZE)

    jax.block_until_ready((h32, h16))

    assert h32.shape == (B, HIDDEN_SIZE)
    assert jnp.allclose(h32, h_ref, atol=1e-5, rtol=1e-5), "f32 path mismatch"
    assert jnp.allclose(h16, h_ref, atol=3e-2, rtol=3e-2), "bf16 path mismatch"

    print("KERNEL_OK")
</pallas_src>

<mosaic_0001>
module attributes {stable_mosaic.version = 11 : i64} {
  func.func @gru_cell_kernel(%arg0: i32, %arg1: i32, %arg2: memref<8x128xf32, #tpu.memory_space<vmem>>, %arg3: memref<8x128xf32, #tpu.memory_space<vmem>>, %arg4: memref<1x128x384xf32, #tpu.memory_space<vmem>>, %arg5: memref<1x128x384xf32, #tpu.memory_space<vmem>>, %arg6: memref<1x1x384xf32, #tpu.memory_space<vmem>>, %arg7: memref<1x1x128xf32, #tpu.memory_space<vmem>>, %arg8: memref<8x128xf32, #tpu.memory_space<vmem>>) attributes {dimension_semantics = [#tpu.dimension_semantics<parallel>, #tpu.dimension_semantics<parallel>], iteration_bounds = array<i64: 1, 1>, scalar_prefetch = 0 : i64, scratch_operands = 0 : i64, tpu.core_type = #tpu.core_type<tc>, window_params = [{transform_indices = @transform_0, window_bounds = array<i64: 8, 128>}, {transform_indices = @transform_1, window_bounds = array<i64: 8, 128>}, {transform_indices = @transform_2, window_bounds = array<i64: 1, 128, 384>}, {transform_indices = @transform_3, window_bounds = array<i64: 1, 128, 384>}, {transform_indices = @transform_4, window_bounds = array<i64: 1, 1, 384>}, {transform_indices = @transform_5, window_bounds = array<i64: 1, 1, 128>}, {transform_indices = @transform_6, window_bounds = array<i64: 8, 128>}]} {
    %c0 = arith.constant 0 : index
    %c0_0 = arith.constant 0 : index
    %0 = vector.load %arg2[%c0, %c0_0] : memref<8x128xf32, #tpu.memory_space<vmem>>, vector<8x128xf32>
    %c0_1 = arith.constant 0 : index
    %c0_2 = arith.constant 0 : index
    %1 = vector.load %arg3[%c0_1, %c0_2] : memref<8x128xf32, #tpu.memory_space<vmem>>, vector<8x128xf32>
    %c0_3 = arith.constant 0 : index
    %c0_4 = arith.constant 0 : index
    %c0_5 = arith.constant 0 : index
    %2 = vector.load %arg4[%c0_3, %c0_4, %c0_5] : memref<1x128x384xf32, #tpu.memory_space<vmem>>, vector<1x128x384xf32>
    %3 = vector.shape_cast %2 : vector<1x128x384xf32> to vector<128x384xf32>
    %cst = arith.constant dense<0.000000e+00> : vector<8x384xf32>
    %4 = tpu.matmul %0, %3, %cst {dimension_numbers = #tpu.dot_dimension_numbers<[1], [0], [0], [1], [0, 0, 1, 1], [], []>} : vector<8x128xf32>, vector<128x384xf32>, vector<8x384xf32> -> vector<8x384xf32>
    %c0_6 = arith.constant 0 : index
    %c0_7 = arith.constant 0 : index
    %c0_8 = arith.constant 0 : index
    %5 = vector.load %arg6[%c0_6, %c0_7, %c0_8] : memref<1x1x384xf32, #tpu.memory_space<vmem>>, vector<1x1x384xf32>
    %6 = vector.shape_cast %5 : vector<1x1x384xf32> to vector<1x384xf32>
    %7 = vector.broadcast %6 : vector<1x384xf32> to vector<8x384xf32>
    %8 = arith.addf %4, %7 : vector<8x384xf32>
    %c0_9 = arith.constant 0 : index
    %c0_10 = arith.constant 0 : index
    %c0_11 = arith.constant 0 : index
    %9 = vector.load %arg5[%c0_9, %c0_10, %c0_11] : memref<1x128x384xf32, #tpu.memory_space<vmem>>, vector<1x128x384xf32>
    %10 = vector.shape_cast %9 : vector<1x128x384xf32> to vector<128x384xf32>
    %cst_12 = arith.constant dense<0.000000e+00> : vector<8x384xf32>
    %11 = tpu.matmul %1, %10, %cst_12 {dimension_numbers = #tpu.dot_dimension_numbers<[1], [0], [0], [1], [0, 0, 1, 1], [], []>} : vector<8x128xf32>, vector<128x384xf32>, vector<8x384xf32> -> vector<8x384xf32>
    %12 = vector.extract_strided_slice %8 {offsets = [0, 0], sizes = [8, 128], strides = [1, 1]} : vector<8x384xf32> to vector<8x128xf32>
    %13 = vector.extract_strided_slice %8 {offsets = [0, 128], sizes = [8, 128], strides = [1, 1]} : vector<8x384xf32> to vector<8x128xf32>
    %14 = vector.extract_strided_slice %8 {offsets = [0, 256], sizes = [8, 128], strides = [1, 1]} : vector<8x384xf32> to vector<8x128xf32>
    %15 = vector.extract_strided_slice %11 {offsets = [0, 0], sizes = [8, 128], strides = [1, 1]} : vector<8x384xf32> to vector<8x128xf32>
    %16 = vector.extract_strided_slice %11 {offsets = [0, 128], sizes = [8, 128], strides = [1, 1]} : vector<8x384xf32> to vector<8x128xf32>
    %17 = vector.extract_strided_slice %11 {offsets = [0, 256], sizes = [8, 128], strides = [1, 1]} : vector<8x384xf32> to vector<8x128xf32>
    %c0_13 = arith.constant 0 : index
    %c0_14 = arith.constant 0 : index
    %c0_15 = arith.constant 0 : index
    %18 = vector.load %arg7[%c0_13, %c0_14, %c0_15] : memref<1x1x128xf32, #tpu.memory_space<vmem>>, vector<1x1x128xf32>
    %19 = vector.shape_cast %18 : vector<1x1x128xf32> to vector<1x128xf32>
    %20 = vector.broadcast %19 : vector<1x128xf32> to vector<8x128xf32>
    %21 = arith.addf %17, %20 : vector<8x128xf32>
    %22 = arith.addf %12, %15 : vector<8x128xf32>
    %23 = arith.negf %22 : vector<8x128xf32>
    %24 = math.exp %23 : vector<8x128xf32>
    %cst_16 = arith.constant 1.000000e+00 : f32
    %25 = vector.broadcast %cst_16 : f32 to vector<8x128xf32>
    %26 = arith.addf %25, %24 : vector<8x128xf32>
    %27 = arith.divf %25, %26 : vector<8x128xf32>
    %28 = arith.addf %13, %16 : vector<8x128xf32>
    %29 = arith.negf %28 : vector<8x128xf32>
    %30 = math.exp %29 : vector<8x128xf32>
    %cst_17 = arith.constant 1.000000e+00 : f32
    %31 = vector.broadcast %cst_17 : f32 to vector<8x128xf32>
    %32 = arith.addf %31, %30 : vector<8x128xf32>
    %33 = arith.divf %31, %32 : vector<8x128xf32>
    %34 = arith.mulf %27, %21 : vector<8x128xf32>
    %35 = arith.addf %14, %34 : vector<8x128xf32>
    %36 = math.tanh %35 : vector<8x128xf32>
    %c128_i32 = arith.constant 128 : i32
    %37 = arith.muli %arg0, %c128_i32 : i32
    %38 = tpu.assume_multiple %37, 128 : i32
    %c0_18 = arith.constant 0 : index
    %39 = arith.index_cast %38 : i32 to index
    %40 = vector.load %arg3[%c0_18, %39] : memref<8x128xf32, #tpu.memory_space<vmem>>, vector<8x128xf32>
    %41 = arith.subf %40, %36 : vector<8x128xf32>
    %42 = arith.mulf %33, %41 : vector<8x128xf32>
    %43 = arith.addf %36, %42 : vector<8x128xf32>
    %c0_19 = arith.constant 0 : index
    %c0_20 = arith.constant 0 : index
    %44 = vector.load %arg8[%c0_19, %c0_20] : memref<8x128xf32, #tpu.memory_space<vmem>>, vector<8x128xf32>
    tpu.vector_store %arg8[%c0_19, %c0_20], %43 {strides = array<i32>} : memref<8x128xf32, #tpu.memory_space<vmem>>, vector<8x128xf32>,
    return
  }
  func.func @transform_0(%arg0: i32, %arg1: i32) -> (i32, i32) {
    %c0_i32 = arith.constant 0 : i32
    %c0_i32_0 = arith.constant 0 : i32
    return %arg1, %c0_i32 : i32, i32
  }
  func.func @transform_1(%arg0: i32, %arg1: i32) -> (i32, i32) {
    %c0_i32 = arith.constant 0 : i32
    %c0_i32_0 = arith.constant 0 : i32
    return %arg1, %c0_i32 : i32, i32
  }
  func.func @transform_2(%arg0: i32, %arg1: i32) -> (i32, i32, i32) {
    %c0_i32 = arith.constant 0 : i32
    %c0_i32_0 = arith.constant 0 : i32
    %c0_i32_1 = arith.constant 0 : i32
    return %arg0, %c0_i32, %c0_i32_0 : i32, i32, i32
  }
  func.func @transform_3(%arg0: i32, %arg1: i32) -> (i32, i32, i32) {
    %c0_i32 = arith.constant 0 : i32
    %c0_i32_0 = arith.constant 0 : i32
    %c0_i32_1 = arith.constant 0 : i32
    return %arg0, %c0_i32, %c0_i32_0 : i32, i32, i32
  }
  func.func @transform_4(%arg0: i32, %arg1: i32) -> (i32, i32, i32) {
    %c0_i32 = arith.constant 0 : i32
    %c0_i32_0 = arith.constant 0 : i32
    %c0_i32_1 = arith.constant 0 : i32
    return %arg0, %c0_i32, %c0_i32_0 : i32, i32, i32
  }
  func.func @transform_5(%arg0: i32, %arg1: i32) -> (i32, i32, i32) {
    %c0_i32 = arith.constant 0 : i32
    %c0_i32_0 = arith.constant 0 : i32
    %c0_i32_1 = arith.constant 0 : i32
    return %arg0, %c0_i32, %c0_i32_0 : i32, i32, i32
  }
  func.func @transform_6(%arg0: i32, %arg1: i32) -> (i32, i32) {
    %c0_i32 = arith.constant 0 : i32
    return %arg1, %arg0 : i32, i32
  }
}

</mosaic_0001>

<bundles_post_ra>
// kernel: gru_cell_forward.1
= control target key start
LH: loop header
LB: loop body
LE: loop exit
PB: predicated region body
PF: predicated region fallthrough
CT: control target
= control target key end

     0   :  { %11 = vsyncpa [#allocation3], 0  ;;  %s880_s0 = inlined_call_operand.vmem [shape: f32[8,128], index: 0, kind: input, shape index: {}]   ;;  %s881_s1 = inlined_call_operand.vmem [shape: f32[8,128], index: 1, kind: input, shape index: {}]   ;;  %s882_s2 = inlined_call_operand.hbm [shape: f32[1,128,384], index: 2, kind: input, shape index: {}]   ;;  %s883_s3 = inlined_call_operand.hbm [shape: f32[1,128,384], index: 3, kind: input, shape index: {}]   ;;  %s884_s4 = inlined_call_operand.vmem [shape: f32[1,1,384], index: 4, kind: input, shape index: {}]   ;;  %s885_s5 = inlined_call_operand.vmem [shape: f32[1,1,128], index: 5, kind: input, shape index: {}]   ;;  %s886_s6 = inlined_call_operand.vmem [shape: f32[8,128], index: 6, kind: output, shape index: {}]  }
   0x1   :  { %12 = vsyncpa [#allocation5], 0  ;;  %s777_s21 = smov [#allocation2]   ;;  %s729_s25 = scalar_lea.hbm %s882_s2, 6144 }
   0x2   :  { %s22_s22 = sshll.u32 %s777_s21, 4  ;;  %p730_p0 = scmp.ne.s32.totalorder %s882_s2, %s729_s25  ;;  %s23_s22 = int_to_ptr.vmem [resolvable:$true] %s22_s22 }
   0x3   :  { %p733_p1 = scmp.lt.u32.totalorder %s729_s25, %s882_s2 }
   0x5   :  { %p735_p2 = pnand %p733_p1, %p730_p0 }
   0x7   :  { %738 = shalt.err (!%p735_p2)
}
   0x8   :  { %s739_s30 = scalar_lea.vmem %s23_s22, 6144  ;;  %p744_p4 = scmp.lt.s32.totalorder %s23_s22, %s23_s22 }
   0x9   :  { %p740_p3 = scmp.ne.s32.totalorder %s23_s22, %s739_s30  ;;  %p745_p5 = scmp.lt.s32.totalorder %s739_s30, %s739_s30 }
   0xb   :  { %p746_p6 = por %p745_p5, %p744_p4 }
   0xd   :  { %p747_p7 = pnand %p746_p6, %p740_p3 }
   0xf   :  { %750 = shalt.err (!%p747_p7)
}
  0x10   :  { %s778_s7 = smov 384   ;;  %s779_s8 = smov 24  }
  0x11   :  { %28 = dma.hbm_to_vmem [thread:$0]  %s882_s2, 6144, %s23_s22, [#allocation3], %s778_s7, %s778_s7, %s779_s8  }
  0x12   :  { %s780_s11 = smov [#allocation4]   ;;  %s751_s15 = scalar_lea.hbm %s883_s3, 6144 }
  0x13   :  { %s34_s12 = sshll.u32 %s780_s11, 4  ;;  %p752_p8 = scmp.ne.s32.totalorder %s883_s3, %s751_s15  ;;  %s35_s12 = int_to_ptr.vmem [resolvable:$true] %s34_s12 }
  0x14   :  { %p755_p9 = scmp.lt.u32.totalorder %s751_s15, %s883_s3 }
  0x16   :  { %p757_p10 = pnand %p755_p9, %p752_p8 }
  0x18   :  { %760 = shalt.err (!%p757_p10)
}
  0x19   :  { %s761_s20 = scalar_lea.vmem %s35_s12, 6144  ;;  %p766_p12 = scmp.lt.s32.totalorder %s35_s12, %s35_s12 }
  0x1a   :  { %p762_p11 = scmp.ne.s32.totalorder %s35_s12, %s761_s20  ;;  %p767_p13 = scmp.lt.s32.totalorder %s761_s20, %s761_s20 }
  0x1c   :  { %p768_p0 = por %p767_p13, %p766_p12 }
  0x1e   :  { %p769_p1 = pnand %p768_p0, %p762_p11 }
  0x20   :  { %772 = shalt.err (!%p769_p1)
}
  0x21   :  { %40 = dma.hbm_to_vmem [thread:$0]  %s883_s3, 6144, %s35_s12, [#allocation5], %s778_s7, %s778_s7, %s779_s8  }
  0x22   :  { %773 = dma.done.wait [#allocation3], 6144  }
  0x23   :  { %774 = vsyncadd [#allocation3], 4294961152 }
  0x24   :  { %775 = dma.done.wait [#allocation5], 6144  }
  0x25   :  { %776 = vsyncadd [#allocation5], 4294961152  ;;  %v781_v0 = vmov 0.0|0.0   ;;  %v782_v1 = vmov 0.0   ;;  %vm783_vm0 = vmmov 0   ;;  %v54_v2 = vld [vmem:[#allocation2 + $0x8] sm:$0xff] }
  0x26   :  { %628 = vmatprep.subr.bf16.mxu1 %v781_v0  ;;  %182 = vmatprep.mubr.f32.mxu0 %v782_v1  ;;  %v57_v3 = vld [vmem:[#allocation2 + $0x20] sm:$0xff]  ;;  %v56_v6 = vld [vmem:[#allocation2 + $0x18] sm:$0xff]  ;;  %v63_v8 = vld [vmem:[#allocation2 + $0x50] sm:$0xff] }
  0x27   :  { %558 = vmatprep.mubr.msk.f32.mxu1 %vm783_vm0, %v782_v1  ;;  %v53_v4 = vld [vmem:[#allocation2] sm:$0xff]  ;;  %v596_v5 = vpack.c.bf16 %v57_v3, %v54_v2  ;;  %v60_v7 = vld [vmem:[#allocation2 + $0x38] sm:$0xff]  ;;  %v59_v11 = vld [vmem:[#allocation2 + $0x30] sm:$0xff] }
  0x28   :  { %v598_v9 = vpack.c.bf16 %v56_v6, %v53_v4  ;;  %v600_v10 = vpack.c.bf16 %v63_v8, %v60_v7  ;;  %v62_v12 = vld [vmem:[#allocation2 + $0x48] sm:$0xff]  ;;  %v69_v14 = vld [vmem:[#allocation2 + $0x80] sm:$0xff]  ;;  %v68_v18 = vld [vmem:[#allocation2 + $0x78] sm:$0xff] }
  0x29   :  { %v66_v13 = vld [vmem:[#allocation2 + $0x68] sm:$0xff]  ;;  %597 = vmatprep.subr.bf16.mxu0 %v596_v5  ;;  %v602_v15 = vpack.c.bf16 %v62_v12, %v59_v11  ;;  %v65_v17 = vld [vmem:[#allocation2 + $0x60] sm:$0xff]  ;;  %v72_v19 = vld [vmem:[#allocation2 + $0x98] sm:$0xff] }
  0x2a   :  { %599 = vmatpush1.bf16.msra.mxu0 %v598_v9  ;;  %v604_v16 = vpack.c.bf16 %v69_v14, %v66_v13  ;;  %v75_v20 = vld [vmem:[#allocation2 + $0xb0] sm:$0xff]  ;;  %v606_v21 = vpack.c.bf16 %v68_v18, %v65_v17  ;;  %v74_v24 = vld [vmem:[#allocation2 + $0xa8] sm:$0xff]  ;;  %v81_v28 = vld [vmem:[#allocation2 + $0xe0] sm:$0xff] }
  0x2b   :  { %601 = vmatprep.subr.bf16.mxu0 %v600_v10  ;;  %v71_v22 = vld [vmem:[#allocation2 + $0x90] sm:$0xff]  ;;  %v608_v23 = vpack.c.bf16 %v75_v20, %v72_v19  ;;  %v58_v26 = vld [vmem:[#allocation2 + $0x28] sm:$0xff]  ;;  %v61_v30 = vld [vmem:[#allocation2 + $0x40] sm:$0xff] }
  0x2c   :  { %v55_v25 = vld [vmem:[#allocation2 + $0x10] sm:$0xff]  ;;  %v78_v27 = vld [vmem:[#allocation2 + $0xc8] sm:$0xff]  ;;  %v64_v31 = vld [vmem:[#allocation2 + $0x58] sm:$0xff]  ;;  %v610_v32 = vpack.c.bf16 %v74_v24, %v71_v22 }
  0x2d   :  { %v629_v29 = vpack.c.bf16 %v58_v26, %v55_v25  ;;  %v632_v33 = vpack.c.bf16 %v64_v31, %v61_v30  ;;  %v612_v34 = vpack.c.bf16 %v81_v28, %v78_v27  ;;  %v77_v35 = vld [vmem:[#allocation2 + $0xc0] sm:$0xff]  ;;  %v80_v36 = vld [vmem:[#allocation2 + $0xd8] sm:$0xff]  ;;  %v67_v37 = vld [vmem:[#allocation2 + $0x70] sm:$0xff] }
  0x2e   :  { %603 = vmatpush1.bf16.msra.mxu0 %v602_v15  ;;  %v84_v38 = vld [vmem:[#allocation2 + $0xf8] sm:$0xff]  ;;  %v87_v39 = vld [vmem:[#allocation2 + $0x110] sm:$0xff]  ;;  %v70_v40 = vld [vmem:[#allocation2 + $0x88] sm:$0xff]  ;;  %v614_v41 = vpack.c.bf16 %v80_v36, %v77_v35 }
  0x2f   :  { %605 = vmatprep.subr.bf16.mxu0 %v604_v16  ;;  %630 = vmatpush3.bf16.msra.mxu1 %v629_v29  ;;  %v83_v42 = vld [vmem:[#allocation2 + $0xf0] sm:$0xff]  ;;  %v635_v43 = vpack.c.bf16 %v70_v40, %v67_v37  ;;  %v616_v44 = vpack.c.bf16 %v87_v39, %v84_v38  ;;  %v86_v45 = vld [vmem:[#allocation2 + $0x108] sm:$0xff]  ;;  %v73_v46 = vld [vmem:[#allocation2 + $0xa0] sm:$0xff] }
  0x30   :  { %631 = vmatprep.subr.bf16.mxu1 %v781_v0  ;;  %v76_v47 = vld [vmem:[#allocation2 + $0xb8] sm:$0xff]  ;;  %v90_v48 = vld [vmem:[#allocation2 + $0x128] sm:$0xff]  ;;  %v93_v49 = vld [vmem:[#allocation2 + $0x140] sm:$0xff]  ;;  %v618_v50 = vpack.c.bf16 %v86_v45, %v83_v42 }
  0x31   :  { %v89_v51 = vld [vmem:[#allocation2 + $0x120] sm:$0xff]  ;;  %v638_v52 = vpack.c.bf16 %v76_v47, %v73_v46  ;;  %v620_v53 = vpack.c.bf16 %v93_v49, %v90_v48  ;;  %v92_v54 = vld [vmem:[#allocation2 + $0x138] sm:$0xff]  ;;  %v79_v55 = vld [vmem:[#allocation2 + $0xd0] sm:$0xff] }
  0x32   :  { %607 = vmatpush1.bf16.msra.mxu0 %v606_v21  ;;  %v82_v56 = vld [vmem:[#allocation2 + $0xe8] sm:$0xff]  ;;  %v96_v57 = vld [vmem:[#allocation2 + $0x158] sm:$0xff]  ;;  %v99_v58 = vld [vmem:[#allocation2 + $0x170] sm:$0xff]  ;;  %v622_v59 = vpack.c.bf16 %v92_v54, %v89_v51 }
  0x33   :  { %609 = vmatprep.subr.bf16.mxu0 %v608_v23  ;;  %633 = vmatpush3.bf16.msra.mxu1 %v632_v33  ;;  %v95_v60 = vld [vmem:[#allocation2 + $0x150] sm:$0xff]  ;;  %v641_v61 = vpack.c.bf16 %v82_v56, %v79_v55  ;;  %v624_v62 = vpack.c.bf16 %v99_v58, %v96_v57  ;;  %v98_v63 = vld [vmem:[#allocation2 + $0x168] sm:$0xff]  ;;  %v85_v2 = vld [vmem:[#allocation2 + $0x100] sm:$0xff] }
  0x34   :  { %634 = vmatprep.subr.bf16.mxu1 %v781_v0  ;;  %v88_v3 = vld [vmem:[#allocation2 + $0x118] sm:$0xff]  ;;  %v260_v4 = vld [vmem:[#allocation4 + $0x8] sm:$0xff]  ;;  %v263_v5 = vld [vmem:[#allocation4 + $0x20] sm:$0xff]  ;;  %v626_v6 = vpack.c.bf16 %v98_v63, %v95_v60 }
  0x35   :  { %v259_v7 = vld [vmem:[#allocation4] sm:$0xff]  ;;  %v644_v8 = vpack.c.bf16 %v88_v3, %v85_v2  ;;  %v652_v9 = vpack.c.bf16 %v263_v5, %v260_v4  ;;  %v262_v10 = vld [vmem:[#allocation4 + $0x18] sm:$0xff]  ;;  %v91_v11 = vld [vmem:[#allocation2 + $0x130] sm:$0xff] }
  0x36   :  { %611 = vmatpush1.bf16.msra.mxu0 %v610_v32  ;;  %v94_v12 = vld [vmem:[#allocation2 + $0x148] sm:$0xff]  ;;  %v266_v13 = vld [vmem:[#allocation4 + $0x38] sm:$0xff]  ;;  %v269_v14 = vld [vmem:[#allocation4 + $0x50] sm:$0xff]  ;;  %v654_v16 = vpack.c.bf16 %v262_v10, %v259_v7 }
  0x37   :  { %613 = vmatprep.subr.bf16.mxu0 %v612_v34  ;;  %636 = vmatpush3.bf16.msra.mxu1 %v635_v43  ;;  %v51_v15 = vld [vmem:[%s880_s0] sm:$0xff]  ;;  %v265_v17 = vld [vmem:[#allocation4 + $0x30] sm:$0xff]  ;;  %v647_v18 = vpack.c.bf16 %v94_v12, %v91_v11  ;;  %v656_v19 = vpack.c.bf16 %v269_v14, %v266_v13  ;;  %v268_v20 = vld [vmem:[#allocation4 + $0x48] sm:$0xff] }
  0x38   :  { %637 = vmatprep.subr.bf16.mxu1 %v781_v0  ;;  %v97_v21 = vld [vmem:[#allocation2 + $0x160] sm:$0xff]  ;;  %v100_v22 = vld [vmem:[#allocation2 + $0x178] sm:$0xff]  ;;  %v272_v23 = vld [vmem:[#allocation4 + $0x68] sm:$0xff]  ;;  %v658_v25 = vpack.c.bf16 %v268_v20, %v265_v17 }
  0x39   :  { %v275_v24 = vld [vmem:[#allocation4 + $0x80] sm:$0xff]  ;;  %v650_v27 = vpack.c.bf16 %v100_v22, %v97_v21  ;;  %v274_v29 = vld [vmem:[#allocation4 + $0x78] sm:$0xff]  ;;  %v261_v30 = vld [vmem:[#allocation4 + $0x10] sm:$0xff] }
  0x3a   :  { %615 = vmatpush1.bf16.msra.mxu0 %v614_v41  ;;  %v271_v26 = vld [vmem:[#allocation4 + $0x60] sm:$0xff]  ;;  %v660_v28 = vpack.c.bf16 %v275_v24, %v272_v23  ;;  %v264_v31 = vld [vmem:[#allocation4 + $0x28] sm:$0xff]  ;;  %v278_v32 = vld [vmem:[#allocation4 + $0x98] sm:$0xff] }
  0x3b   :  { %617 = vmatprep.subr.bf16.mxu0 %v616_v44  ;;  %639 = vmatpush3.bf16.msra.mxu1 %v638_v52  ;;  %v281_v33 = vld [vmem:[#allocation4 + $0xb0] sm:$0xff]  ;;  %v662_v34 = vpack.c.bf16 %v274_v29, %v271_v26  ;;  %v685_v36 = vpack.c.bf16 %v264_v31, %v261_v30  ;;  %v280_v38 = vld [vmem:[#allocation4 + $0xa8] sm:$0xff]  ;;  %v267_v39 = vld [vmem:[#allocation4 + $0x40] sm:$0xff] }
  0x3c   :  { %640 = vmatprep.subr.bf16.mxu1 %v781_v0  ;;  %v277_v35 = vld [vmem:[#allocation4 + $0x90] sm:$0xff]  ;;  %v664_v37 = vpack.c.bf16 %v281_v33, %v278_v32  ;;  %v270_v40 = vld [vmem:[#allocation4 + $0x58] sm:$0xff]  ;;  %v284_v41 = vld [vmem:[#allocation4 + $0xc8] sm:$0xff] }
  0x3d   :  { %v287_v42 = vld [vmem:[#allocation4 + $0xe0] sm:$0xff]  ;;  %v666_v43 = vpack.c.bf16 %v280_v38, %v277_v35  ;;  %v688_v45 = vpack.c.bf16 %v270_v40, %v267_v39  ;;  %v286_v47 = vld [vmem:[#allocation4 + $0xd8] sm:$0xff]  ;;  %v273_v48 = vld [vmem:[#allocation4 + $0x70] sm:$0xff] }
  0x3e   :  { %619 = vmatpush1.bf16.msra.mxu0 %v618_v50  ;;  %v283_v44 = vld [vmem:[#allocation4 + $0xc0] sm:$0xff]  ;;  %v668_v46 = vpack.c.bf16 %v287_v42, %v284_v41  ;;  %v276_v49 = vld [vmem:[#allocation4 + $0x88] sm:$0xff]  ;;  %v290_v50 = vld [vmem:[#allocation4 + $0xf8] sm:$0xff] }
  0x3f   :  { %621 = vmatprep.subr.bf16.mxu0 %v620_v53  ;;  %642 = vmatpush3.bf16.msra.mxu1 %v641_v61  ;;  %v293_v51 = vld [vmem:[#allocation4 + $0x110] sm:$0xff]  ;;  %v670_v52 = vpack.c.bf16 %v286_v47, %v283_v44  ;;  %v691_v54 = vpack.c.bf16 %v276_v49, %v273_v48  ;;  %v292_v56 = vld [vmem:[#allocation4 + $0x108] sm:$0xff]  ;;  %v279_v57 = vld [vmem:[#allocation4 + $0xa0] sm:$0xff] }
  0x40   :  { %643 = vmatprep.subr.bf16.mxu1 %v781_v0  ;;  %v289_v53 = vld [vmem:[#allocation4 + $0xf0] sm:$0xff]  ;;  %v672_v55 = vpack.c.bf16 %v293_v51, %v290_v50  ;;  %v282_v58 = vld [vmem:[#allocation4 + $0xb8] sm:$0xff]  ;;  %v299_v60 = vld [vmem:[#allocation4 + $0x140] sm:$0xff] }
  0x41   :  { %v674_v61 = vpack.c.bf16 %v292_v56, %v289_v53  ;;  %v694_v63 = vpack.c.bf16 %v282_v58, %v279_v57  ;;  %v298_v2 = vld [vmem:[#allocation4 + $0x138] sm:$0xff]  ;;  %v285_v3 = vld [vmem:[#allocation4 + $0xd0] sm:$0xff]  ;;  %v288_v4 = vld [vmem:[#allocation4 + $0xe8] sm:$0xff] }
  0x42   :  { %623 = vmatpush1.bf16.msra.mxu0 %v622_v59  ;;  %v296_v59 = vld [vmem:[#allocation4 + $0x128] sm:$0xff]  ;;  %v302_v5 = vld [vmem:[#allocation4 + $0x158] sm:$0xff]  ;;  %v291_v12 = vld [vmem:[#allocation4 + $0x100] sm:$0xff] }
  0x43   :  { %625 = vmatprep.subr.bf16.mxu0 %v624_v62  ;;  %645 = vmatpush3.bf16.msra.mxu1 %v644_v8  ;;  %v295_v62 = vld [vmem:[#allocation4 + $0x120] sm:$0xff]  ;;  %v301_v8 = vld [vmem:[#allocation4 + $0x150] sm:$0xff]  ;;  %v304_v11 = vld [vmem:[#allocation4 + $0x168] sm:$0xff] }
  0x44   :  { %646 = vmatprep.subr.bf16.mxu1 %v781_v0  ;;  %v678_v7 = vpack.c.bf16 %v298_v2, %v295_v62  ;;  %v294_v13 = vld [vmem:[#allocation4 + $0x118] sm:$0xff]  ;;  %v682_v14 = vpack.c.bf16 %v304_v11, %v301_v8  ;;  %v300_v17 = vld [vmem:[#allocation4 + $0x148] sm:$0xff]  ;;  %v303_v20 = vld [vmem:[#allocation4 + $0x160] sm:$0xff] }
  0x45   :  { %v306_v21 = vld [vmem:[#allocation4 + $0x178] sm:$0xff]  ;;  %v489_v42 = vld [vmem:[%s885_s5] ss:$0 sm:$0xff] }
  0x46   :  { %627 = vmatpush1.bf16.msra.mxu0 %v626_v6  ;;  %v305_v6 = vld [vmem:[#allocation4 + $0x170] sm:$0xff]  ;;  %v706_v22 = vpack.c.bf16 %v306_v21, %v303_v20 }
  0x47   :  { %653 = vmatprep.subr.bf16.mxu0 %v652_v9  ;;  %648 = vmatpush3.bf16.msra.mxu1 %v647_v18  ;;  %v697_v9 = vpack.c.bf16 %v288_v4, %v285_v3  ;;  %v680_v10 = vpack.c.bf16 %v305_v6, %v302_v5  ;;  %v52_v18 = vld [vmem:[%s881_s1] sm:$0xff] }
  0x48   :  { %649 = vmatprep.subr.bf16.mxu1 %v781_v0 }
  0x49   :  { %183 = vmatmul.mubr.f32.vlgmr.msra.gmra.mrb[0].mxu0 %v51_v15 }
  0x4a   :  { %655 = vmatpush1.bf16.msra.mxu0 %v654_v16  ;;  %371 = vmatprep.mubr.f32.mxu0 %v782_v1  ;;  %v297_v16 = vld [vmem:[#allocation4 + $0x130] sm:$0xff] }
  0x4b   :  { %657 = vmatprep.subr.bf16.mxu0 %v656_v19  ;;  %651 = vmatpush3.bf16.msra.mxu1 %v650_v27  ;;  %v703_v19 = vpack.c.bf16 %v300_v17, %v297_v16 }
  0x4c   :  { %684 = vmatprep.subr.bf16.mxu1 %v781_v0 }
  0x4e   :  { %659 = vmatpush1.bf16.msra.mxu0 %v658_v25  ;;  %559 = vmatmul.mubr.f32.vlgmr.msra.gmra.mrb[0].mxu1 %v51_v15  ;;  %v700_v15 = vpack.c.bf16 %v294_v13, %v291_v12  ;;  %v103_v25 = vlaneseq }
  0x4f   :  { %661 = vmatprep.subr.bf16.mxu0 %v660_v28  ;;  %686 = vmatpush3.bf16.msra.mxu1 %v685_v36  ;;  %v101_v28 = vld [vmem:[%s884_s4] sm:$0x7] }
  0x50   :  { %687 = vmatprep.subr.bf16.mxu1 %v781_v0  ;;  %593 = vmatprep.mubr.msk.f32.mxu1 %vm783_vm0, %v782_v1  ;;  %v676_v1 = vpack.c.bf16 %v299_v60, %v296_v59  ;;  %v104_v26 = vshrl.u32 %v103_v25, 7 }
  0x52   :  { %663 = vmatpush1.bf16.msra.mxu0 %v662_v34  ;;  %v105_v27 = vsub.s32 0, %v104_v26  ;;  %v109_v32 = vsub.s32 1, %v104_v26  ;;  %v113_v41 = vsub.s32 2, %v104_v26 }
  0x53   :  { %665 = vmatprep.subr.bf16.mxu0 %v664_v37  ;;  %689 = vmatpush3.bf16.msra.mxu1 %v688_v45 }
  0x54   :  { %690 = vmatprep.subr.bf16.mxu1 %v781_v0  ;;  %v106_v29 = vrot.slane %v101_v28, %v105_v27  ;;  %v110_v35 = vrot.slane %v101_v28, %v109_v32 }
  0x56   :  { %667 = vmatpush1.bf16.msra.mxu0 %v666_v43  ;;  %v114_v43 = vrot.slane %v101_v28, %v113_v41 }
  0x57   :  { %669 = vmatprep.subr.bf16.mxu0 %v668_v46  ;;  %692 = vmatpush3.bf16.msra.mxu1 %v691_v54 }
  0x58   :  { %693 = vmatprep.subr.bf16.mxu1 %v781_v0 }
  0x5a   :  { %671 = vmatpush1.bf16.msra.mxu0 %v670_v52 }
  0x5b   :  { %673 = vmatprep.subr.bf16.mxu0 %v672_v55  ;;  %695 = vmatpush3.bf16.msra.mxu1 %v694_v63 }
  0x5c   :  { %696 = vmatprep.subr.bf16.mxu1 %v781_v0 }
  0x5e   :  { %675 = vmatpush1.bf16.msra.mxu0 %v674_v61 }
  0x5f   :  { %677 = vmatprep.subr.bf16.mxu0 %v676_v1  ;;  %698 = vmatpush3.bf16.msra.mxu1 %v697_v9 }
  0x60   :  { %699 = vmatprep.subr.bf16.mxu1 %v781_v0 }
  0x62   :  { %679 = vmatpush1.bf16.msra.mxu0 %v678_v7 }
  0x63   :  { %681 = vmatprep.subr.bf16.mxu0 %v680_v10  ;;  %701 = vmatpush3.bf16.msra.mxu1 %v700_v15 }
  0x64   :  { %702 = vmatprep.subr.bf16.mxu1 %v781_v0 }
  0x66   :  { %683 = vmatpush1.bf16.msra.mxu0 %v682_v14 }
  0x67   :  { %704 = vmatpush3.bf16.msra.mxu1 %v703_v19 }
  0x68   :  { %705 = vmatprep.subr.bf16.mxu1 %v781_v0 }
  0x69   :  { %372 = vmatmul.mubr.f32.vlgmr.msra.gmra.mrb[0].mxu0 %v52_v18 }
  0x6b   :  { %707 = vmatpush3.bf16.msra.mxu1 %v706_v22 }
  0x6e   :  { %594 = vmatmul.mubr.f32.vlgmr.msra.gmra.mrb[2].mxu1 %v52_v18 }
 0x121   :  { %v255_v23 = vpop.f32.mrb[0].mxu1 }
 0x122   :  { %v560_v24 = vpop.f32.mrb[1].mxu1  ;;  %v256_v47 = vadd.f32 %v255_v23, %v114_v43 }
 0x13c   :  { %v373_v30 = vpop.f32.mrb[0].mxu0 }
 0x13d   :  { %v708_v31 = vadd.f32 %v373_v30, %v106_v29  ;;  %v375_v33 = vpop.f32.mrb[1].mxu0 }
 0x13e   :  { %v709_v36 = vadd.f32 %v375_v33, %v110_v35 }
 0x13f   :  { %v490_v34 = vmul.f32 -1.442695, %v708_v31 }
 0x140   :  { %v491_v38 = vmul.f32 -1.442695, %v709_v36 }
 0x141   :  { %719 = vpow2.f32 %v490_v34  ;;  %v444_v0 = vpop.f32.mrb[2].mxu1 }
 0x142   :  { %v595_v37 = vpop.f32.mrb[3].mxu1  ;;  %721 = vpow2.f32 %v491_v38  ;;  %v455_v44 = vadd.f32 %v489_v42, %v444_v0 }
 0x14b   :  { %v720_v39 = vpop.eup %719 }
 0x14c   :  { %v460_v40 = vadd.f32 1.0, %v720_v39  ;;  %v722_v45 = vpop.eup %721 }
 0x14d   :  { %v467_v49 = vadd.f32 1.0, %v722_v45 }
 0x14e   :  { %723 = vrcp.f32 %v460_v40 }
 0x158   :  { %v724_v46 = vpop.eup %723 }
 0x159   :  { %v470_v48 = vmul.f32 %v724_v46, %v455_v44 }
 0x15b   :  { %v471_v50 = vadd.f32 %v470_v48, %v256_v47 }
 0x15d   :  { %725 = vtanh.f32 %v471_v50 }
 0x15e   :  { %727 = vrcp.f32 %v467_v49 }
 0x167   :  { %v726_v51 = vpop.eup %725 }
 0x168   :  { %v478_v52 = vsub.f32 %v52_v18, %v726_v51  ;;  %v728_v53 = vpop.eup %727 }
 0x16a   :  { %v479_v54 = vmul.f32 %v728_v53, %v478_v52 }
 0x16c   :  { %v480_v55 = vadd.f32 %v726_v51, %v479_v54 }
 0x16e   :  { %481 = vst [vmem:[%s886_s6] sm:$0xff] %v480_v55 }
 0x16f   :  { %486 = vsyncpa [#allocation3], 1 }
 0x170   :  { %487 = vsyncpa [#allocation5], 1 }

</bundles_post_ra>
